<compile_context>
chip_gen: v6e
topology: v6e:2x2x1
jax: 0.10.0
libtpu: 0.0.40
codegen_flags: <defaults>
</compile_context>

<pallas_src>
import functools

import jax
import jax.numpy as jnp
from jax.experimental import pallas as pl
from jax.experimental.pallas import tpu as pltpu

_EPS = 1e-5
_SQRT2 = 1.4142135623730951
_HALF_SQRT2 = 0.7071067811865476


def _gelu_prescaled(s):
    """Exact (erf) GELU of v, given s = v / sqrt(2).

    The 1/sqrt(2) is folded into the preceding fc1 weights/bias in the wrapper,
    so:  gelu(v) = 0.5*v*(1+erf(v/sqrt(2))) = (sqrt(2)/2) * s * (1 + erf(s)).
    """
    return _HALF_SQRT2 * s * (1.0 + jax.lax.erf(s))


def _layernorm_tc(v):
    """LayerNorm over the full (T, C) slab per batch element (no affine),
    two-pass statistics (matches F.layer_norm / the reference numerically)."""
    mu = jnp.mean(v, axis=(1, 2), keepdims=True)
    d = v - mu
    var = jnp.mean(d * d, axis=(1, 2), keepdims=True)
    return d * jax.lax.rsqrt(var + _EPS)


def _mixer_block_kernel(x_ref, tw1_ref, tb1_ref, tw2_ref, tb2_ref,
                        cw1t_ref, cb1_ref, cw2t_ref, cb2_ref, o_ref,
                        tok_ref, *, hc_chunk):
    """One grid step processes a block of Bb batch elements.

    x_ref    : (Bb, T, C)
    tw1_ref  : (Mt, T)   token fc1 weight (PyTorch (out,in)), pre-scaled by 1/sqrt(2)
    tb1_ref  : (Mt, 1)   token fc1 bias (column), pre-scaled by 1/sqrt(2)
    tw2_ref  : (T, Mt)   token fc2 weight
    tb2_ref  : (T, 1)    token fc2 bias (column)
    cw1t_ref : (C, Hc)   channel fc1 weight^T, pre-scaled by 1/sqrt(2)
    cb1_ref  : (1, Hc)   channel fc1 bias (row), pre-scaled by 1/sqrt(2)
    cw2t_ref : (Hc, C)   channel fc2 weight^T
    cb2_ref  : (1, C)    channel fc2 bias (row)
    o_ref    : (Bb, T, C)
    tok_ref  : (Bb, T, C) f32 VMEM scratch for the token-mixer output
    """
    Bb, T, C = x_ref.shape
    Hc = cw1t_ref.shape[1]
    cdt = tw1_ref.dtype                       # matmul operand dtype (bf16 or f32)

    xb = x_ref[...].astype(jnp.float32)       # (Bb, T, C)

    # --- LayerNorm #1 over the whole (T, C) slab, per batch element ---
    y = _layernorm_tc(xb)

    # --- Token mixing: Linear over T, written as left-multiplications so no
    #     in-kernel transposes are needed. Bb is a small static constant, so
    #     this unrolls into independent 2-D MXU matmuls (N = C lanes). Results
    #     go straight into VMEM scratch (no jnp.stack materialization).
    tw1 = tw1_ref[...]
    tb1 = tb1_ref[...]
    tw2 = tw2_ref[...]
    tb2 = tb2_ref[...]
    for b in range(Bb):
        hb = jnp.dot(tw1, y[b].astype(cdt),
                     preferred_element_type=jnp.float32) + tb1          # (Mt, C)
        gb = _gelu_prescaled(hb)
        tok_ref[b] = jnp.dot(tw2, gb.astype(cdt),
                             preferred_element_type=jnp.float32) + tb2  # (T, C)

    x1 = xb + tok_ref[...]                     # residual 1, (Bb, T, C)

    # --- LayerNorm #2 ---
    z = _layernorm_tc(x1)

    # --- Channel mixing: fold (Bb, T) into the matmul M dimension so both dots
    #     are large, lane-dense MXU matmuls; chunk the hidden dim so the
    #     (Bb*T, Hc) intermediate never fully materializes. ---
    z2 = z.reshape(Bb * T, C).astype(cdt)
    acc = jnp.zeros((Bb * T, C), jnp.float32)
    n_chunks = Hc // hc_chunk
    for ci in range(n_chunks):                                 # static unroll
        lo = ci * hc_chunk
        hi = lo + hc_chunk
        h = jnp.dot(z2, cw1t_ref[:, lo:hi],
                    preferred_element_type=jnp.float32) + cb1_ref[:, lo:hi]
        h = _gelu_prescaled(h)                                  # (Bb*T, hc_chunk)
        acc = acc + jnp.dot(h.astype(cdt), cw2t_ref[lo:hi, :],
                            preferred_element_type=jnp.float32)
    ch = acc + cb2_ref[...]                                     # (Bb*T, C)

    o_ref[...] = (x1 + ch.reshape(Bb, T, C)).astype(o_ref.dtype)  # residual 2


def _vmem_capacity_bytes():
    """Physical VMEM per core (generation-aware); conservative fallback."""
    try:
        info = pltpu.get_tpu_info()
        cap = getattr(info, "vmem_capacity_bytes", None)
        if cap:
            return int(cap)
    except Exception:
        pass
    return 64 << 20   # v7x-sized fallback (safe lower bound)


def _pick_hc_chunk(Hc, max_chunk=1024):
    """Largest 128-aligned divisor of Hc that is <= max_chunk (else full Hc)."""
    if Hc <= max_chunk:
        return Hc
    for c in range(max_chunk, 127, -128):
        if Hc % c == 0:
            return c
    return Hc


def _pick_block_batch(B, T, C, Mt, hc_chunk, weight_bytes, usable_vmem,
                      x_itemsize=4):
    """Largest divisor of B whose per-block working set fits the VMEM budget,
    capped so that a 2-TensorCore part still gets >=2 grid steps per core and
    the static token-mixer unroll stays small.

    Returns (Bb, per_block_element_bytes_estimate)."""
    per_b = (4 * (10 * T * C + 2 * Mt * C + 2 * T * hc_chunk)   # f32 activations
             + 4 * T * C * x_itemsize)                          # double-buffered I/O
    budget = max(usable_vmem - weight_bytes, per_b)
    cap = max(1, budget // per_b)
    cap = min(cap, 8, max(1, B // 4))   # >=4 grid steps when B>=4 (v7x: 2 per TC)
    bb = 1
    for d in range(1, B + 1):
        if B % d == 0 and d <= cap:
            bb = d
    return bb, per_b


def _weight_spec(a):
    """Grid-invariant (resident) weight: single-buffer it — double-buffering a
    constant block only duplicates it in VMEM."""
    n = a.ndim
    idx = lambda b, _n=n: (0,) * _n
    try:
        return pl.BlockSpec(a.shape, idx, pipeline_mode=pl.Buffered(1))
    except TypeError:   # older BlockSpec without pipeline_mode
        return pl.BlockSpec(a.shape, idx)


def mixer_block_pallas(x, params, *, use_bf16=True, block_batch=None):
    """x: (B, T, C) float32. params: dict of PyTorch-layout weights/biases.

    use_bf16 (default True): bf16 matmul operands with f32 MXU accumulation —
    ~3-4x MXU throughput and half the weight VMEM. Set False for exact f32.
    """
    B, T, C = x.shape
    inv_sqrt2 = jnp.float32(1.0 / _SQRT2)

    # fc1 weights/biases pre-scaled by 1/sqrt(2): the erf argument then comes
    # straight out of the matmul (exact GELU semantics preserved).
    tw1 = params["tw1"] * inv_sqrt2                      # (Mt, T)
    tb1 = (params["tb1"] * inv_sqrt2).reshape(-1, 1)     # (Mt, 1)
    tw2 = params["tw2"]                                  # (T, Mt)
    tb2 = params["tb2"].reshape(-1, 1)                   # (T, 1)
    cw1t = (params["cw1"] * inv_sqrt2).T                 # (C, Hc)
    cb1 = (params["cb1"] * inv_sqrt2).reshape(1, -1)     # (1, Hc)
    cw2t = params["cw2"].T                               # (Hc, C)
    cb2 = params["cb2"].reshape(1, -1)                   # (1, C)

    wdt = jnp.bfloat16 if use_bf16 else jnp.float32
    tw1 = tw1.astype(wdt)
    tw2 = tw2.astype(wdt)
    cw1t = cw1t.astype(wdt)
    cw2t = cw2t.astype(wdt)
    # Biases stay f32 (added to the f32 MXU accumulation).
    tb1 = tb1.astype(jnp.float32)
    tb2 = tb2.astype(jnp.float32)
    cb1 = cb1.astype(jnp.float32)
    cb2 = cb2.astype(jnp.float32)

    Mt = tw1.shape[0]
    Hc = cw1t.shape[1]
    hc_chunk = _pick_hc_chunk(Hc)

    weights = (tw1, tb1, tw2, tb2, cw1t, cb1, cw2t, cb2)
    wbytes = sum(int(w.size) * w.dtype.itemsize for w in weights)

    vmem_cap = _vmem_capacity_bytes()
    usable_vmem = (vmem_cap * 3) // 4          # headroom for compiler scratch etc.

    if block_batch is not None:
        Bb = block_batch
        _, per_b = _pick_block_batch(B, T, C, Mt, hc_chunk, wbytes, usable_vmem,
                                     x.dtype.itemsize)
    else:
        Bb, per_b = _pick_block_batch(B, T, C, Mt, hc_chunk, wbytes, usable_vmem,
                                      x.dtype.itemsize)
    assert B % Bb == 0, (B, Bb)
    nb = B // Bb

    def x_idx(b):
        return (b, 0, 0)

    in_specs = [pl.BlockSpec((Bb, T, C), x_idx)] + [_weight_spec(w) for w in weights]
    out_specs = pl.BlockSpec((Bb, T, C), x_idx)

    # Advisory cost estimate for XLA's scheduler.
    xbytes = int(x.size) * x.dtype.itemsize
    cost = pl.CostEstimate(
        flops=int(4 * B * T * C * (Mt + Hc)),
        transcendentals=int(B * (Mt * C + T * Hc)),
        bytes_accessed=int(2 * xbytes + wbytes))

    # VMEM request: single-buffered weights + this block's working set, capped
    # well below physical capacity (generation-aware; never the full chip VMEM).
    vmem_limit = int(min(usable_vmem,
                         max(16 << 20, wbytes + Bb * per_b + (2 << 20))))

    kernel = functools.partial(_mixer_block_kernel, hc_chunk=hc_chunk)

    return pl.pallas_call(
        kernel,
        out_shape=jax.ShapeDtypeStruct((B, T, C), x.dtype),
        grid_spec=pltpu.PrefetchScalarGridSpec(
            num_scalar_prefetch=0,
            grid=(nb,),
            in_specs=in_specs,
            out_specs=out_specs,
            scratch_shapes=[pltpu.VMEM((Bb, T, C), jnp.float32)],
        ),
        compiler_params=pltpu.CompilerParams(
            dimension_semantics=("parallel",),
            vmem_limit_bytes=vmem_limit),
        cost_estimate=cost,
    )(x, *weights)


def mixer_block_reference(x, params):
    """Pure-JAX reference mirroring the PyTorch forward exactly."""
    def ln_all(v):
        mu = jnp.mean(v, axis=(1, 2), keepdims=True)
        var = jnp.mean((v - mu) ** 2, axis=(1, 2), keepdims=True)
        return (v - mu) / jnp.sqrt(var + _EPS)

    def gelu(v):
        return 0.5 * v * (1.0 + jax.lax.erf(v / _SQRT2))

    y = ln_all(x)
    y = jnp.swapaxes(y, 1, 2)                               # (B, C, T)
    y = gelu(y @ params["tw1"].T + params["tb1"]) @ params["tw2"].T + params["tb2"]
    y = jnp.swapaxes(y, 1, 2)                               # (B, T, C)
    x = x + y
    y = ln_all(x)
    y = gelu(y @ params["cw1"].T + params["cb1"]) @ params["cw2"].T + params["cb2"]
    return x + y


def _init_params(key, tokens_dim, tokens_mlp_dim, channels_dim, channels_mlp_dim):
    ks = jax.random.split(key, 8)
    u = lambda k, shape, fan_in: jax.random.uniform(
        k, shape, jnp.float32, -1.0, 1.0) / jnp.sqrt(jnp.float32(fan_in))
    return {
        # token_mixer (features=tokens_dim, hidden=tokens_mlp_dim)
        "tw1": u(ks[0], (tokens_mlp_dim, tokens_dim), tokens_dim),
        "tb1": u(ks[1], (tokens_mlp_dim,), tokens_dim),
        "tw2": u(ks[2], (tokens_dim, tokens_mlp_dim), tokens_mlp_dim),
        "tb2": u(ks[3], (tokens_dim,), tokens_mlp_dim),
        # channel_mixer (features=channels_dim, hidden=channels_mlp_dim)
        "cw1": u(ks[4], (channels_mlp_dim, channels_dim), channels_dim),
        "cb1": u(ks[5], (channels_mlp_dim,), channels_dim),
        "cw2": u(ks[6], (channels_dim, channels_mlp_dim), channels_mlp_dim),
        "cb2": u(ks[7], (channels_dim,), channels_mlp_dim),
    }


if __name__ == "__main__":
    B = 4
    tokens_dim = 8        # T
    channels_dim = 32     # C
    tokens_mlp_dim = 16   # Mt
    channels_mlp_dim = 64 # Hc

    key = jax.random.PRNGKey(0)
    kx, kp = jax.random.split(key)
    x = jax.random.normal(kx, (B, tokens_dim, channels_dim), jnp.float32)
    params = _init_params(kp, tokens_dim, tokens_mlp_dim,
                          channels_dim, channels_mlp_dim)

    ref = mixer_block_reference(x, params)

    # Exact f32 path — tight tolerance.
    out_f32 = jax.block_until_ready(mixer_block_pallas(x, params, use_bf16=False))
    assert out_f32.shape == ref.shape == (B, tokens_dim, channels_dim)
    assert jnp.allclose(out_f32, ref, atol=1e-4, rtol=1e-4), (
        float(jnp.max(jnp.abs(out_f32 - ref))))

    # Default bf16-operand fast path (f32 accumulation) — looser tolerance.
    out = jax.block_until_ready(mixer_block_pallas(x, params))
    assert jnp.allclose(out, ref, atol=2e-1, rtol=5e-2), (
        float(jnp.max(jnp.abs(out - ref))))

    print("KERNEL_OK")
</pallas_src>

<mosaic_0001>
module attributes {stable_mosaic.version = 11 : i64} {
  func.func @_mixer_block_kernel(%arg0: i32, %arg1: memref<1x8x32xf32, #tpu.memory_space<vmem>>, %arg2: memref<16x8xf32, #tpu.memory_space<vmem>>, %arg3: memref<16x1xf32, #tpu.memory_space<vmem>>, %arg4: memref<8x16xf32, #tpu.memory_space<vmem>>, %arg5: memref<8x1xf32, #tpu.memory_space<vmem>>, %arg6: memref<32x64xf32, #tpu.memory_space<vmem>>, %arg7: memref<1x64xf32, #tpu.memory_space<vmem>>, %arg8: memref<64x32xf32, #tpu.memory_space<vmem>>, %arg9: memref<1x32xf32, #tpu.memory_space<vmem>>, %arg10: memref<1x8x32xf32, #tpu.memory_space<vmem>>, %arg11: memref<1x8x32xf32, #tpu.memory_space<vmem>>) attributes {dimension_semantics = [#tpu.dimension_semantics<parallel>], iteration_bounds = array<i64: 4>, scalar_prefetch = 0 : i64, scratch_operands = 1 : i64, tpu.core_type = #tpu.core_type<tc>, window_params = [{transform_indices = @transform_0, window_bounds = array<i64: 1, 8, 32>}, {pipeline_mode = #tpu.pipeline_mode<synchronous>, transform_indices = @transform_1, window_bounds = array<i64: 16, 8>}, {pipeline_mode = #tpu.pipeline_mode<synchronous>, transform_indices = @transform_2, window_bounds = array<i64: 16, 1>}, {pipeline_mode = #tpu.pipeline_mode<synchronous>, transform_indices = @transform_3, window_bounds = array<i64: 8, 16>}, {pipeline_mode = #tpu.pipeline_mode<synchronous>, transform_indices = @transform_4, window_bounds = array<i64: 8, 1>}, {pipeline_mode = #tpu.pipeline_mode<synchronous>, transform_indices = @transform_5, window_bounds = array<i64: 32, 64>}, {pipeline_mode = #tpu.pipeline_mode<synchronous>, transform_indices = @transform_6, window_bounds = array<i64: 1, 64>}, {pipeline_mode = #tpu.pipeline_mode<synchronous>, transform_indices = @transform_7, window_bounds = array<i64: 64, 32>}, {pipeline_mode = #tpu.pipeline_mode<synchronous>, transform_indices = @transform_8, window_bounds = array<i64: 1, 32>}, {transform_indices = @transform_9, window_bounds = array<i64: 1, 8, 32>}]} {
    %c0 = arith.constant 0 : index
    %c0_0 = arith.constant 0 : index
    %c0_1 = arith.constant 0 : index
    %0 = vector.load %arg1[%c0, %c0_0, %c0_1] : memref<1x8x32xf32, #tpu.memory_space<vmem>>, vector<1x8x32xf32>
    %cst = arith.constant dense<0.000000e+00> : vector<1xf32>
    %1 = vector.multi_reduction <add>, %0, %cst [1, 2] : vector<1x8x32xf32> to vector<1xf32>
    %2 = vector.shape_cast %1 : vector<1xf32> to vector<1x1x1xf32>
    %cst_2 = arith.constant 2.560000e+02 : f32
    %3 = vector.broadcast %cst_2 : f32 to vector<1x1x1xf32>
    %4 = arith.divf %2, %3 : vector<1x1x1xf32>
    %5 = vector.broadcast %4 : vector<1x1x1xf32> to vector<1x8x32xf32>
    %6 = arith.subf %0, %5 : vector<1x8x32xf32>
    %7 = arith.mulf %6, %6 : vector<1x8x32xf32>
    %cst_3 = arith.constant dense<0.000000e+00> : vector<1xf32>
    %8 = vector.multi_reduction <add>, %7, %cst_3 [1, 2] : vector<1x8x32xf32> to vector<1xf32>
    %9 = vector.shape_cast %8 : vector<1xf32> to vector<1x1x1xf32>
    %cst_4 = arith.constant 2.560000e+02 : f32
    %10 = vector.broadcast %cst_4 : f32 to vector<1x1x1xf32>
    %11 = arith.divf %9, %10 : vector<1x1x1xf32>
    %cst_5 = arith.constant 9.99999974E-6 : f32
    %12 = vector.broadcast %cst_5 : f32 to vector<1x1x1xf32>
    %13 = arith.addf %11, %12 : vector<1x1x1xf32>
    %14 = math.rsqrt %13 : vector<1x1x1xf32>
    %15 = vector.broadcast %14 : vector<1x1x1xf32> to vector<1x8x32xf32>
    %16 = arith.mulf %6, %15 : vector<1x8x32xf32>
    %c0_6 = arith.constant 0 : index
    %c0_7 = arith.constant 0 : index
    %17 = vector.load %arg2[%c0_6, %c0_7] : memref<16x8xf32, #tpu.memory_space<vmem>>, vector<16x8xf32>
    %c0_8 = arith.constant 0 : index
    %c0_9 = arith.constant 0 : index
    %18 = vector.load %arg3[%c0_8, %c0_9] : memref<16x1xf32, #tpu.memory_space<vmem>>, vector<16x1xf32>
    %c0_10 = arith.constant 0 : index
    %c0_11 = arith.constant 0 : index
    %19 = vector.load %arg4[%c0_10, %c0_11] : memref<8x16xf32, #tpu.memory_space<vmem>>, vector<8x16xf32>
    %c0_12 = arith.constant 0 : index
    %c0_13 = arith.constant 0 : index
    %20 = vector.load %arg5[%c0_12, %c0_13] : memref<8x1xf32, #tpu.memory_space<vmem>>, vector<8x1xf32>
    %21 = vector.shape_cast %16 : vector<1x8x32xf32> to vector<8x32xf32>
    %cst_14 = arith.constant dense<0.000000e+00> : vector<16x32xf32>
    %22 = tpu.matmul %17, %21, %cst_14 {dimension_numbers = #tpu.dot_dimension_numbers<[1], [0], [0], [1], [0, 0, 1, 1], [], []>} : vector<16x8xf32>, vector<8x32xf32>, vector<16x32xf32> -> vector<16x32xf32>
    %23 = vector.broadcast %18 : vector<16x1xf32> to vector<16x32xf32>
    %24 = arith.addf %22, %23 : vector<16x32xf32>
    %cst_15 = arith.constant 0.707106769 : f32
    %25 = vector.broadcast %cst_15 : f32 to vector<16x32xf32>
    %26 = arith.mulf %25, %24 : vector<16x32xf32>
    %27 = math.erf %24 : vector<16x32xf32>
    %cst_16 = arith.constant 1.000000e+00 : f32
    %28 = vector.broadcast %cst_16 : f32 to vector<16x32xf32>
    %29 = arith.addf %28, %27 : vector<16x32xf32>
    %30 = arith.mulf %26, %29 : vector<16x32xf32>
    %cst_17 = arith.constant dense<0.000000e+00> : vector<8x32xf32>
    %31 = tpu.matmul %19, %30, %cst_17 {dimension_numbers = #tpu.dot_dimension_numbers<[1], [0], [0], [1], [0, 0, 1, 1], [], []>} : vector<8x16xf32>, vector<16x32xf32>, vector<8x32xf32> -> vector<8x32xf32>
    %32 = vector.broadcast %20 : vector<8x1xf32> to vector<8x32xf32>
    %33 = arith.addf %31, %32 : vector<8x32xf32>
    %c0_18 = arith.constant 0 : index
    %c0_19 = arith.constant 0 : index
    %c0_20 = arith.constant 0 : index
    %34 = vector.load %arg11[%c0_18, %c0_19, %c0_20] : memref<1x8x32xf32, #tpu.memory_space<vmem>>, vector<1x8x32xf32>
    %35 = vector.shape_cast %34 : vector<1x8x32xf32> to vector<8x32xf32>
    %36 = vector.shape_cast %33 : vector<8x32xf32> to vector<1x8x32xf32>
    tpu.vector_store %arg11[%c0_18, %c0_19, %c0_20], %36 {strides = array<i32>} : memref<1x8x32xf32, #tpu.memory_space<vmem>>, vector<1x8x32xf32>,
    %c0_21 = arith.constant 0 : index
    %c0_22 = arith.constant 0 : index
    %c0_23 = arith.constant 0 : index
    %37 = vector.load %arg11[%c0_21, %c0_22, %c0_23] : memref<1x8x32xf32, #tpu.memory_space<vmem>>, vector<1x8x32xf32>
    %38 = arith.addf %0, %37 : vector<1x8x32xf32>
    %cst_24 = arith.constant dense<0.000000e+00> : vector<1xf32>
    %39 = vector.multi_reduction <add>, %38, %cst_24 [1, 2] : vector<1x8x32xf32> to vector<1xf32>
    %40 = vector.shape_cast %39 : vector<1xf32> to vector<1x1x1xf32>
    %cst_25 = arith.constant 2.560000e+02 : f32
    %41 = vector.broadcast %cst_25 : f32 to vector<1x1x1xf32>
    %42 = arith.divf %40, %41 : vector<1x1x1xf32>
    %43 = vector.broadcast %42 : vector<1x1x1xf32> to vector<1x8x32xf32>
    %44 = arith.subf %38, %43 : vector<1x8x32xf32>
    %45 = arith.mulf %44, %44 : vector<1x8x32xf32>
    %cst_26 = arith.constant dense<0.000000e+00> : vector<1xf32>
    %46 = vector.multi_reduction <add>, %45, %cst_26 [1, 2] : vector<1x8x32xf32> to vector<1xf32>
    %47 = vector.shape_cast %46 : vector<1xf32> to vector<1x1x1xf32>
    %cst_27 = arith.constant 2.560000e+02 : f32
    %48 = vector.broadcast %cst_27 : f32 to vector<1x1x1xf32>
    %49 = arith.divf %47, %48 : vector<1x1x1xf32>
    %cst_28 = arith.constant 9.99999974E-6 : f32
    %50 = vector.broadcast %cst_28 : f32 to vector<1x1x1xf32>
    %51 = arith.addf %49, %50 : vector<1x1x1xf32>
    %52 = math.rsqrt %51 : vector<1x1x1xf32>
    %53 = vector.broadcast %52 : vector<1x1x1xf32> to vector<1x8x32xf32>
    %54 = arith.mulf %44, %53 : vector<1x8x32xf32>
    %55 = vector.shape_cast %54 : vector<1x8x32xf32> to vector<8x32xf32>
    %cst_29 = arith.constant 0.000000e+00 : f32
    %56 = vector.broadcast %cst_29 : f32 to vector<8x32xf32>
    %c0_30 = arith.constant 0 : index
    %c0_31 = arith.constant 0 : index
    %57 = vector.load %arg6[%c0_30, %c0_31] : memref<32x64xf32, #tpu.memory_space<vmem>>, vector<32x64xf32>
    %cst_32 = arith.constant dense<0.000000e+00> : vector<8x64xf32>
    %58 = tpu.matmul %55, %57, %cst_32 {dimension_numbers = #tpu.dot_dimension_numbers<[1], [0], [0], [1], [0, 0, 1, 1], [], []>} : vector<8x32xf32>, vector<32x64xf32>, vector<8x64xf32> -> vector<8x64xf32>
    %c0_33 = arith.constant 0 : index
    %c0_34 = arith.constant 0 : index
    %59 = vector.load %arg7[%c0_33, %c0_34] : memref<1x64xf32, #tpu.memory_space<vmem>>, vector<1x64xf32>
    %60 = vector.broadcast %59 : vector<1x64xf32> to vector<8x64xf32>
    %61 = arith.addf %58, %60 : vector<8x64xf32>
    %cst_35 = arith.constant 0.707106769 : f32
    %62 = vector.broadcast %cst_35 : f32 to vector<8x64xf32>
    %63 = arith.mulf %62, %61 : vector<8x64xf32>
    %64 = math.erf %61 : vector<8x64xf32>
    %cst_36 = arith.constant 1.000000e+00 : f32
    %65 = vector.broadcast %cst_36 : f32 to vector<8x64xf32>
    %66 = arith.addf %65, %64 : vector<8x64xf32>
    %67 = arith.mulf %63, %66 : vector<8x64xf32>
    %c0_37 = arith.constant 0 : index
    %c0_38 = arith.constant 0 : index
    %68 = vector.load %arg8[%c0_37, %c0_38] : memref<64x32xf32, #tpu.memory_space<vmem>>, vector<64x32xf32>
    %cst_39 = arith.constant dense<0.000000e+00> : vector<8x32xf32>
    %69 = tpu.matmul %67, %68, %cst_39 {dimension_numbers = #tpu.dot_dimension_numbers<[1], [0], [0], [1], [0, 0, 1, 1], [], []>} : vector<8x64xf32>, vector<64x32xf32>, vector<8x32xf32> -> vector<8x32xf32>
    %70 = arith.addf %56, %69 : vector<8x32xf32>
    %c0_40 = arith.constant 0 : index
    %c0_41 = arith.constant 0 : index
    %71 = vector.load %arg9[%c0_40, %c0_41] : memref<1x32xf32, #tpu.memory_space<vmem>>, vector<1x32xf32>
    %72 = vector.broadcast %71 : vector<1x32xf32> to vector<8x32xf32>
    %73 = arith.addf %70, %72 : vector<8x32xf32>
    %74 = vector.shape_cast %73 : vector<8x32xf32> to vector<1x8x32xf32>
    %75 = arith.addf %38, %74 : vector<1x8x32xf32>
    %c0_42 = arith.constant 0 : index
    %c0_43 = arith.constant 0 : index
    %c0_44 = arith.constant 0 : index
    %76 = vector.load %arg10[%c0_42, %c0_43, %c0_44] : memref<1x8x32xf32, #tpu.memory_space<vmem>>, vector<1x8x32xf32>
    tpu.vector_store %arg10[%c0_42, %c0_43, %c0_44], %75 {strides = array<i32>} : memref<1x8x32xf32, #tpu.memory_space<vmem>>, vector<1x8x32xf32>,
    return
  }
  func.func @transform_0(%arg0: i32) -> (i32, i32, i32) {
    %c0_i32 = arith.constant 0 : i32
    %c0_i32_0 = arith.constant 0 : i32
    %c0_i32_1 = arith.constant 0 : i32
    return %arg0, %c0_i32, %c0_i32_0 : i32, i32, i32
  }
  func.func @transform_1(%arg0: i32) -> (i32, i32) {
    %c0_i32 = arith.constant 0 : i32
    %c0_i32_0 = arith.constant 0 : i32
    %c0_i32_1 = arith.constant 0 : i32
    return %c0_i32, %c0_i32_0 : i32, i32
  }
  func.func @transform_2(%arg0: i32) -> (i32, i32) {
    %c0_i32 = arith.constant 0 : i32
    %c0_i32_0 = arith.constant 0 : i32
    %c0_i32_1 = arith.constant 0 : i32
    return %c0_i32, %c0_i32_0 : i32, i32
  }
  func.func @transform_3(%arg0: i32) -> (i32, i32) {
    %c0_i32 = arith.constant 0 : i32
    %c0_i32_0 = arith.constant 0 : i32
    %c0_i32_1 = arith.constant 0 : i32
    return %c0_i32, %c0_i32_0 : i32, i32
  }
  func.func @transform_4(%arg0: i32) -> (i32, i32) {
    %c0_i32 = arith.constant 0 : i32
    %c0_i32_0 = arith.constant 0 : i32
    %c0_i32_1 = arith.constant 0 : i32
    return %c0_i32, %c0_i32_0 : i32, i32
  }
  func.func @transform_5(%arg0: i32) -> (i32, i32) {
    %c0_i32 = arith.constant 0 : i32
    %c0_i32_0 = arith.constant 0 : i32
    %c0_i32_1 = arith.constant 0 : i32
    return %c0_i32, %c0_i32_0 : i32, i32
  }
  func.func @transform_6(%arg0: i32) -> (i32, i32) {
    %c0_i32 = arith.constant 0 : i32
    %c0_i32_0 = arith.constant 0 : i32
    %c0_i32_1 = arith.constant 0 : i32
    return %c0_i32, %c0_i32_0 : i32, i32
  }
  func.func @transform_7(%arg0: i32) -> (i32, i32) {
    %c0_i32 = arith.constant 0 : i32
    %c0_i32_0 = arith.constant 0 : i32
    %c0_i32_1 = arith.constant 0 : i32
    return %c0_i32, %c0_i32_0 : i32, i32
  }
  func.func @transform_8(%arg0: i32) -> (i32, i32) {
    %c0_i32 = arith.constant 0 : i32
    %c0_i32_0 = arith.constant 0 : i32
    %c0_i32_1 = arith.constant 0 : i32
    return %c0_i32, %c0_i32_0 : i32, i32
  }
  func.func @transform_9(%arg0: i32) -> (i32, i32, i32) {
    %c0_i32 = arith.constant 0 : i32
    %c0_i32_0 = arith.constant 0 : i32
    %c0_i32_1 = arith.constant 0 : i32
    return %arg0, %c0_i32, %c0_i32_0 : i32, i32, i32
  }
}

</mosaic_0001>

<bundles_post_ra>
// kernel: tpu_custom_call.1
= control target key start
LH: loop header
LB: loop body
LE: loop exit
PB: predicated region body
PF: predicated region fallthrough
CT: control target
= control target key end

     0   :  { %14 = vsyncpa [#allocation4], 0  ;;  %s1256_s0 = inlined_call_operand.vmem [shape: f32[4,8,32], index: 0, kind: input, shape index: {}]   ;;  %s1257_s1 = inlined_call_operand.vmem [shape: f32[16,8], index: 1, kind: input, shape index: {}]   ;;  %s1258_s2 = inlined_call_operand.vmem [shape: f32[16,1], index: 2, kind: input, shape index: {}]   ;;  %s1259_s3 = inlined_call_operand.vmem [shape: f32[8,16], index: 3, kind: input, shape index: {}]   ;;  %s1260_s4 = inlined_call_operand.vmem [shape: f32[8,1], index: 4, kind: input, shape index: {}]   ;;  %s1261_s5 = inlined_call_operand.vmem [shape: f32[32,64], index: 5, kind: input, shape index: {}]   ;;  %s1262_s6 = inlined_call_operand.vmem [shape: f32[1,64], index: 6, kind: input, shape index: {}]   ;;  %s1263_s7 = inlined_call_operand.vmem [shape: f32[64,32], index: 7, kind: input, shape index: {}]   ;;  %s1264_s8 = inlined_call_operand.vmem [shape: f32[1,32], index: 8, kind: input, shape index: {}]   ;;  %s1265_s9 = inlined_call_operand.hbm [shape: f32[4,8,32], index: 9, kind: output, shape index: {}]  }
   0x1   :  { %16 = vsyncpa [#allocation4 + $0x1], 0  ;;  %s1070_s30 = smov 0   ;;  %s1072_s10 = smov 0  }
   0x2   :  { %s1074_s11 = smov 0   ;;  %s1076_s12 = smov 0  }
   0x3 LB: > { %s1091_s13 = sadd.s32 4294967295, %s1014_s12   ;;  %s821_s14 = sadd.s32 4294967294, %s1014_s12   ;;  %s1014_s12 = sphi %s1076_s12, %s1271_s12   ;;  %s1010_s11 = sphi %s1074_s11, %s1270_s11   ;;  %s1006_s10 = sphi %s1072_s10, %s1269_s10   ;;  %s1002_s30 = sphi %s1070_s30, %s1268_s30  }
   0x4   : > { %s1095_s15 = sadd.s32 1, %s1014_s12   ;;  %s223_s16 = sadd.s32 1, %s1010_s11 }
   0x5   : > { %s220_s17 = ssub.s32 %s1014_s12, %s1095_s15  ;;  %p233_p0 = scmp.ne.s32.totalorder %s1010_s11, %s1006_s10 }
   0x6   : > { %p221_p1 = scmp.eq.s32.totalorder %s220_s17, 0  ;;  %p234_p2 = scmp.eq.s32.totalorder %s1091_s13, 3 }
   0x7   : > { %p239_p3 = scmp.ne.s32.totalorder %s1006_s10, %s1002_s30  ;;  %p240_p4 = scmp.eq.s32.totalorder %s821_s14, 3 }
   0x8   : > { %s1106_s18 = scalar_select %p221_p1, %s1010_s11, %s223_s16  }
   0x9   : > { %p1108_p5 = por %p234_p2, %p233_p0  ;;  %p1112_p6 = por %p240_p4, %p239_p3 }
   0xa   : > { %p824_p7 = scmp.ge.s32.totalorder %s1014_s12, 1  ;;  %p289_p8 = scmp.lt.s32.totalorder %s1014_s12, 5 }
   0xc   : > { %p290_p9 = pnand %p824_p7, %p289_p8 }
   0xd   : > { %p324_p10 = scmp.lt.s32.totalorder (!%p290_p9), %s1091_s13, 3  ;;  %s321_s28 = sand.u32 (!%p290_p9), 1, %s1006_s10  }
   0xe   : > { %293 = sbr.rel (%p290_p9) target bundleno = 1526 (0x5f6), region = 56  ;;  %s825_s29 = sshll.u32 (!%p290_p9), %s321_s28, 3 }
   0xf   : > { %s835_s17 = sshll.u32 (!%p290_p9), %s1091_s13, 7  ;;  %s749_s26 = scalar_lea.sflag (!%p290_p9), [#allocation4], %s321_s28 }
  0x13   : > { %s325_s21 = scalar_select %p324_p10, %s1091_s13, 3  ;;  %vm329_vm0 = vcmask 261120   ;;  %v356_v13 = vld [vmem:[%s1257_s1] sm:$0xff]  ;;  %vm372_vm1 = vcmask 64512   ;;  %v359_v14 = vld [vmem:[%s1258_s2 + $0x8] sm:$0xff]  ;;  %v1016_v15 = vmov 0  }
  0x14   : > { %860 = vmatprep.mubr.msk.f32.mxu0 %vm372_vm1, %v356_v13  ;;  %942 = vset.pattern.permute.xlu1 %v1016_v15  ;;  %v358_v16 = vld [vmem:[%s1258_s2] sm:$0xff]  ;;  %v357_v28 = vld [vmem:[%s1257_s1 + $0x8] sm:$0xff]  ;;  %v1017_v29 = vmov 0.0   ;;  %vm1018_vm2 = vmmov 0   ;;  %vm467_vm3 = vcmask 130048   ;;  %vm672_vm4 = vcmask 523264  }
  0x15   : > { %s826_s22 = sshll.u32 %s325_s21, 3  ;;  %943 = vset.pattern.permute.xlu0 %v1016_v15  ;;  %369 = vperm.xlu1 %942, %v359_v14   ;;  %v361_v30 = vld [vmem:[%s1260_s4] sm:$0xff]  ;;  %v664_v15 = vld [vmem:[%s1263_s7 + $0x38] sm:$0xff]  ;;  %s323_s21 = scalar_lea.vmem [#allocation3], %s825_s29 }
  0x16   : > { %s327_s25 = scalar_lea.vmem %s1256_s0, %s826_s22  ;;  %881 = vmatprep.subr.mxu1 %v1017_v29  ;;  %897 = vmatprep.mubr.msk.f32.mxu1 %vm1018_vm2, %v1017_v29  ;;  %v360_v45 = vld [vmem:[%s1259_s3] sm:$0xff]  ;;  %s762_s22 = sshll.u32 %s323_s21, 4  ;;  %s763_s22 = int_to_ptr.vmem [resolvable:$true] %s762_s22 }
  0x17   : > { %v1123_v0 = vld [vmem:[%s327_s25] sm:$0xff]  ;;  %882 = vmatpush3.msra.mxu1 %v664_v15  ;;  %s760_s25 = scalar_lea.hbm %s1265_s9, %s835_s17  ;;  %s954_s27 = scalar_lea.vmem %s763_s22, 128 }
  0x18   : > { %v330_v1 = vsel %vm329_vm0, %v1123_v0, 0.0  ;;  %883 = vmatprep.subr.mxu1 %v1017_v29  ;;  %p955_p11 = scmp.ne.s32.totalorder %s763_s22, %s954_s27  ;;  %s1019_s13 = smov [#allocation3]  }
  0x19   : > { %331 = vadd.xlane.f32.xlu0 %v330_v1  ;;  %364 = vperm.xlu1 %942, %v358_v16   ;;  %v571_v1 = vld [vmem:[%s1261_s5 + $0x10] sm:$0xff]  ;;  %s958_s29 = sshll.u32 %s1019_s13, 4  ;;  %s959_s29 = int_to_ptr.vmem [resolvable:$false] %s958_s29 }
  0x1a   : > { %v663_v16 = vld [vmem:[%s1263_s7 + $0x30] sm:$0xff]  ;;  %p956_p12 = pnand %p955_p11, %p1108_p5  ;;  %s960_s14 = scalar_lea.vmem %s959_s29, 256 }
  0x1b   : > { %884 = vmatpush3.msra.mxu1 %v663_v16  ;;  %p961_p0 = scmp.lt.s32.totalorder %s763_s22, %s959_s29  ;;  %p962_p1 = scmp.lt.s32.totalorder %s960_s14, %s954_s27 }
  0x1c   : > { %885 = vmatprep.subr.mxu1 %v1017_v29  ;;  %p957_p13 = pneg %p956_p12 }
  0x1d   : > { %p963_p2 = por %p962_p1, %p961_p0 }
  0x1f   : > { %p964_p3 = pnand %p963_p2, %p957_p13 }
  0x90   : > { %v370_v31 = vpop.permute.xlu1 %369 }
  0x94   : > { %v365_v34 = vpop.permute.xlu1 %364 }
  0xa2   : > { %v332_v2 = vpop.xlane.xlu0 %331 }
  0xa3   : > { %v333_v3 = vrot.slane %v332_v2, 4 }
  0xa5   : > { %v334_v4 = vadd.f32 %v333_v3, %v332_v2  ;;  %v570_v2 = vld [vmem:[%s1261_s5 + $0x8] sm:$0xff]  ;;  %v569_v3 = vld [vmem:[%s1261_s5] sm:$0xff] }
  0xa7   : > { %v335_v5 = vrot.slane %v334_v4, 2 }
  0xa9   : > { %v336_v6 = vadd.f32 %v335_v5, %v334_v4 }
  0xab   : > { %v337_v7 = vrot.slane %v336_v6, 1 }
  0xad   : > { %v338_v8 = vadd.f32 %v337_v7, %v336_v6 }
  0xaf   : > { %v340_v9 = vmul.f32 0.00390625, %v338_v8 }
  0xb1   : > { %v341_v10 = vsub.f32 %v1123_v0, %v340_v9 }
  0xb3   : > { %v342_v11 = vmul.f32 %v341_v10, %v341_v10 }
  0xb5   : > { %v343_v12 = vsel %vm329_vm0, %v342_v11, 0.0 }
  0xb6   : > { %344 = vadd.xlane.f32.xlu0 %v343_v12 }
  0xcc   : > { %464 = vperm.xlu0 %943, %v361_v30  }
 0x13f   : > { %v345_v17 = vpop.xlane.xlu0 %344 }
 0x140   : > { %v346_v18 = vrot.slane %v345_v17, 4 }
 0x142   : > { %v347_v19 = vadd.f32 %v346_v18, %v345_v17  ;;  %v662_v17 = vld [vmem:[%s1263_s7 + $0x28] sm:$0xff]  ;;  %v661_v18 = vld [vmem:[%s1263_s7 + $0x20] sm:$0xff] }
 0x143   : > { %886 = vmatpush3.msra.mxu1 %v662_v17 }
 0x144   : > { %v348_v20 = vrot.slane %v347_v19, 2  ;;  %887 = vmatprep.subr.mxu1 %v1017_v29 }
 0x145   : > { %888 = vmatpush3.msra.mxu1 %v661_v18 }
 0x146   : > { %v349_v21 = vadd.f32 %v348_v20, %v347_v19  ;;  %889 = vmatprep.subr.mxu1 %v1017_v29  ;;  %v660_v19 = vld [vmem:[%s1263_s7 + $0x18] sm:$0xff]  ;;  %v659_v20 = vld [vmem:[%s1263_s7 + $0x10] sm:$0xff] }
 0x147   : > { %v465_v46 = vpop.permute.xlu0 %464  ;;  %890 = vmatpush3.msra.mxu1 %v660_v19 }
 0x148   : > { %v350_v22 = vrot.slane %v349_v21, 1  ;;  %891 = vmatprep.subr.mxu1 %v1017_v29 }
 0x149   : > { %892 = vmatpush3.msra.mxu1 %v659_v20 }
 0x14a   : > { %v351_v23 = vadd.f32 %v350_v22, %v349_v21  ;;  %893 = vmatprep.subr.mxu1 %v1017_v29  ;;  %v658_v21 = vld [vmem:[%s1263_s7 + $0x8] sm:$0xff]  ;;  %v657_v22 = vld [vmem:[%s1263_s7] sm:$0xff] }
 0x14b   : > { %894 = vmatpush3.msra.mxu1 %v658_v21 }
 0x14c   : > { %v352_v24 = vmul.f32 0.00390625, %v351_v23  ;;  %895 = vmatprep.subr.mxu1 %v1017_v29  ;;  %v830_v23 = vld [vmem:[%s1262_s6] ss:$0 sm:$0xff] }
 0x14d   : > { %896 = vmatpush3.msra.mxu1 %v657_v22 }
 0x14e   : > { %v353_v25 = vadd.f32 1e-05, %v352_v24 }
 0x150   : > { %944 = vrsqrt.f32 %v353_v25 }
 0x15d   : > { %v945_v26 = vpop.eup %944 }
 0x15e   : > { %v355_v27 = vmul.f32 %v945_v26, %v341_v10 }
 0x160   : > { %858 = vmatprep.subr.mxu0 %v355_v27 }
 0x161   : > { %859 = vmatpush3.msra.mxu0 %v355_v27 }
 0x162   : > { %861 = vmatmul.mubr.msk.f32.vlgmr.msra.gmra.mxu0 %vm372_vm1, %v357_v28  ;;  %863 = vmatprep.subr.mxu0 %v1017_v29 }
 0x163   : > { %867 = vmatprep.mubr.msk.f32.mxu0 %vm1018_vm2, %v1017_v29 }
 0x222   : > { %v862_v32 = vpop.f32.mrf.mxu0 }
 0x223   : > { %v451_v33 = vadd.f32 %v862_v32, %v370_v31 }
 0x224   : > { %v445_v35 = vpop.f32.mrf.mxu0 }
 0x225   : > { %946 = verf.f32 %v451_v33  ;;  %v446_v36 = vadd.f32 %v445_v35, %v365_v34  ;;  %v455_v38 = vmul.f32 0.70710677, %v451_v33 }
 0x227   : > { %948 = verf.f32 %v446_v36  ;;  %v454_v42 = vmul.f32 0.70710677, %v446_v36 }
 0x232   : > { %v947_v37 = vpop.eup %946 }
 0x233   : > { %v459_v39 = vadd.f32 1.0, %v947_v37 }
 0x234   : > { %v949_v40 = vpop.eup %948 }
 0x235   : > { %v461_v41 = vmul.f32 %v459_v39, %v455_v38  ;;  %v458_v43 = vadd.f32 1.0, %v949_v40 }
 0x237   : > { %v460_v44 = vmul.f32 %v458_v43, %v454_v42  ;;  %864 = vmatpush3.msra.mxu0 %v461_v41 }
 0x238   : > { %865 = vmatprep.subr.mxu0 %v1017_v29 }
 0x239   : > { %866 = vmatpush3.msra.mxu0 %v460_v44 }
 0x23a   : > { %868 = vmatmul.mubr.msk.f32.vlgmr.msra.gmra.mxu0 %vm467_vm3, %v360_v45  ;;  %870 = vmatprep.subr.mxu0 %v1017_v29 }
 0x23b   : > { %878 = vmatprep.mubr.msk.f32.mxu0 %vm1018_vm2, %v1017_v29 }
 0x2fa   : > { %v537_v47 = vpop.f32.mrf.mxu0 }
 0x2fb   : > { %v538_v48 = vadd.f32 %v537_v47, %v465_v46 }
 0x2fc   : > { %v869_v49 = vpop.f32.mrf.mxu0 }
 0x2fd   : > { %541 = vst.msk [vmem:[#allocation2] sm:$0xff] %vm329_vm0, %v538_v48 }
 0x304   : > { %v542_v50 = vld [vmem:[#allocation2] sm:$0xff] }
 0x305   : > { %v1161_v51 = vadd.f32 %v542_v50, %v1123_v0  ;;  %v572_v0 = vld [vmem:[%s1261_s5 + $0x18] sm:$0xff] }
 0x306   : > { %871 = vmatpush3.msra.mxu0 %v572_v0 }
 0x307   : > { %v544_v52 = vsel %vm329_vm0, %v1161_v51, 0.0  ;;  %872 = vmatprep.subr.mxu0 %v1017_v29 }
 0x308   : > { %545 = vadd.xlane.f32.xlu1 %v544_v52  ;;  %873 = vmatpush3.msra.mxu0 %v571_v1 }
 0x309   : > { %874 = vmatprep.subr.mxu0 %v1017_v29 }
 0x30a   : > { %875 = vmatpush3.msra.mxu0 %v570_v2 }
 0x30b   : > { %876 = vmatprep.subr.mxu0 %v1017_v29  ;;  %v832_v29 = vld [vmem:[%s1264_s8] ss:$0 sm:$0xff] }
 0x30c   : > { %877 = vmatpush3.msra.mxu0 %v569_v3 }
 0x391   : > { %v546_v53 = vpop.xlane.xlu1 %545 }
 0x392   : > { %v547_v54 = vrot.slane %v546_v53, 4 }
 0x394   : > { %v548_v55 = vadd.f32 %v547_v54, %v546_v53 }
 0x396   : > { %v549_v56 = vrot.slane %v548_v55, 2 }
 0x398   : > { %v550_v57 = vadd.f32 %v549_v56, %v548_v55 }
 0x39a   : > { %v551_v58 = vrot.slane %v550_v57, 1 }
 0x39c   : > { %v552_v59 = vadd.f32 %v551_v58, %v550_v57 }
 0x39e   : > { %v553_v60 = vmul.f32 0.00390625, %v552_v59 }
 0x3a0   : > { %v554_v61 = vsub.f32 %v1161_v51, %v553_v60 }
 0x3a2   : > { %v555_v62 = vmul.f32 %v554_v61, %v554_v61 }
 0x3a4   : > { %v556_v63 = vsel %vm329_vm0, %v555_v62, 0.0 }
 0x3a5   : > { %557 = vadd.xlane.f32.xlu1 %v556_v63 }
 0x42e   : > { %v558_v4 = vpop.xlane.xlu1 %557 }
 0x42f   : > { %v559_v5 = vrot.slane %v558_v4, 4 }
 0x431   : > { %v560_v6 = vadd.f32 %v559_v5, %v558_v4 }
 0x433   : > { %v561_v7 = vrot.slane %v560_v6, 2 }
 0x435   : > { %v562_v8 = vadd.f32 %v561_v7, %v560_v6 }
 0x437   : > { %v563_v9 = vrot.slane %v562_v8, 1 }
 0x439   : > { %v564_v10 = vadd.f32 %v563_v9, %v562_v8 }
 0x43b   : > { %v565_v11 = vmul.f32 0.00390625, %v564_v10 }
 0x43d   : > { %v566_v12 = vadd.f32 1e-05, %v565_v11 }
 0x43f   : > { %950 = vrsqrt.f32 %v566_v12 }
 0x44c   : > { %v951_v13 = vpop.eup %950 }
 0x44d   : > { %v568_v14 = vmul.f32 %v951_v13, %v554_v61 }
 0x44f   : > { %879 = vmatmul.mubr.msk.f32.vlgmr.msra.gmra.mxu0 %vm329_vm0, %v568_v14 }
 0x50f   : > { %v649_v24 = vpop.f32.mrf.mxu0 }
 0x510   : > { %v650_v25 = vadd.f32 %v830_v23, %v649_v24 }
 0x511   : > { %v880_v26 = vpop.f32.mrf.mxu0 }
 0x512   : > { %952 = verf.f32 %v650_v25  ;;  %v653_v28 = vmul.f32 0.70710677, %v650_v25 }
 0x51f   : > { %v953_v27 = vpop.eup %952 }
 0x520   : > { %v655_v30 = vadd.f32 1.0, %v953_v27 }
 0x522   : > { %v656_v31 = vmul.f32 %v655_v30, %v653_v28 }
 0x524   : > { %898 = vmatmul.mubr.msk.f32.vlgmr.msra.gmra.mxu1 %vm672_vm4, %v656_v31 }
 0x5e4   : > { %v742_v32 = vpop.f32.mrf.mxu1 }
 0x5e5   : > { %v743_v33 = vadd.f32 %v832_v29, %v742_v32 }
 0x5e6   : > { %v899_v34 = vpop.f32.mrf.mxu1 }
 0x5e7   : > { %v746_v35 = vadd.f32 %v743_v33, %v1161_v51 }
 0x5e9   : > { %747 = vst.msk [vmem:[%s323_s21] sm:$0xff] %vm329_vm0, %v746_v35 }
 0x5ea   : > { %967 = shalt.err (!%p964_p3)
}
 0x5eb   : > { %s968_s16 = scalar_lea.hbm %s760_s25, 128  ;;  %s972_s21 = scalar_lea.hbm %s1265_s9, 512 }
 0x5ec   : > { %p969_p4 = scmp.ne.s32.totalorder %s760_s25, %s968_s16  ;;  %p973_p9 = scmp.lt.s32.totalorder %s760_s25, %s1265_s9 }
 0x5ed   : > { %p974_p10 = scmp.lt.s32.totalorder %s972_s21, %s968_s16 }
 0x5ee   : > { %p970_p7 = pnand %p969_p4, %p1108_p5 }
 0x5ef   : > { %p975_p11 = por %p974_p10, %p973_p9 }
 0x5f0   : > { %p971_p8 = pneg %p970_p7 }
 0x5f2   : > { %p976_p12 = pnand %p975_p11, %p971_p8 }
 0x5f4   : > { %979 = shalt.err (!%p976_p12)
}
 0x5f5   : > { %900 = dma.vmem_to_hbm [thread:$0]  (%p1108_p5), %s763_s22, 128, %s760_s25, %s749_s26  }
 0x5f6 PF: > { %p906_p13 = scmp.ge.s32.totalorder %s1014_s12, 2  ;;  %s774_s27 = sand.u32 1, %s1002_s30  }
 0x5f7   : > { %s775_s13 = scalar_lea.sflag [#allocation4], %s774_s27 }
 0x5f8   : > { %p903_p0 = pnand %p906_p13, %p1112_p6 }
 0x5fa   : > { %p904_p1 = pneg %p903_p0 }
 0x5fc   : > { %997 = dma.done.wait (%p904_p1), %s775_s13, 128  }
 0x5fd   : > { %999 = vsyncadd (%p904_p1), %s775_s13, 4294967168  ;;  %p19_p2 = scmp.ge.s32.totalorder %s1095_s15, 6   ;;  %s1268_s30 = smov %s1006_s10 }
 0x5fe   : > { %s1269_s10 = smov %s1010_s11  ;;  %s1270_s11 = smov %s1106_s18 }
 0x5ff   : > { %s1271_s12 = smov %s1095_s15  ;;  %21 = sbr.rel (!%p19_p2) target bundleno = 3 (0x3), region = 91 }
 0x604   :  { %780 = vsyncpa [#allocation4], 1 }
 0x605   :  { %782 = vsyncpa [#allocation4 + $0x1], 1 }

</bundles_post_ra>
